<compile_context>
chip_gen: v5e
topology: v5e:2x2
jax: 0.10.0
libtpu: 0.0.40
codegen_flags: <defaults>
</compile_context>

<pallas_src>
import jax
import jax.numpy as jnp
from jax.experimental import pallas as pl
from jax.experimental.pallas import tpu as pltpu


def _fused_conv_block_kernel(x_ref, wb1_ref, s1_ref, t1_ref,
                             wb2_ref, s2_ref, t2_ref,
                             o_ref, xp_ref, yp_ref):
    """Fused (Conv3x3 + BN(eval) + ReLU) x 2 for a group of Nb batch elements.

    x_ref:   (Nb, H, W*Cin)       bf16 input rows, channels on the lane axis
    wb1_ref: (3, W*Cin,  W*Cout)  bf16 layer-1 band (Toeplitz) weights, per ky
    s1_ref:  (1, W*Cout)          f32 layer-1 BN scale, tiled over W
    t1_ref:  (1, W*Cout)          f32 layer-1 folded shift (= shift + b*scale)
    wb2_ref: (3, W*Cout, W*Cout)  bf16 layer-2 band weights
    s2_ref, t2_ref: (1, W*Cout)   f32
    o_ref:   (Nb, H, W*Cout)      f32 lane-dense output slab
    xp_ref:  (Nb*(H+2), W*Cin)    f32 scratch: stacked per-element padded rows
    yp_ref:  (Nb*(H+2), W*Cout)   f32 scratch: padded layer-1 output
    """
    Nb, H, WCin = x_ref.shape
    WCout = o_ref.shape[2]
    Hp = H + 2                     # per-element padded height
    Mp = Nb * Hp                   # total stacked padded rows
    Mm = Mp - 2                    # matmul M (padded output rows 1..Mp-2)

    f32 = jnp.float32
    bf16 = jnp.bfloat16

    # ---- stage layer-1 input: interior rows per element + zero row halos ----
    # (Halos re-zeroed every grid step: scratch persists across iterations and
    #  across megacore partitions, so a program_id==0 guard would be wrong.)
    for e in range(Nb):
        r0 = e * Hp
        xp_ref[r0:r0 + 1, :] = jnp.zeros((1, WCin), f32)
        xp_ref[r0 + 1:r0 + 1 + H, :] = x_ref[e].astype(f32)
        xp_ref[r0 + H + 1:r0 + H + 2, :] = jnp.zeros((1, WCin), f32)

    # ---- layer 1: 3 row-shifted band matmuls over all Nb elements at once ---
    # Rows whose padded index falls on a per-element halo are garbage (they mix
    # neighbouring elements); they are never extracted and are re-zeroed in yp.
    # bf16 MXU operands, f32 accumulate; the pure accumulate chain is kept
    # adjacent (no interleaved VPU work) so v7x can accumulate in the MRB.
    acc = jnp.dot(xp_ref[0:Mm, :].astype(bf16), wb1_ref[0],
                  preferred_element_type=f32)
    acc = acc + jnp.dot(xp_ref[1:Mm + 1, :].astype(bf16), wb1_ref[1],
                        preferred_element_type=f32)
    acc = acc + jnp.dot(xp_ref[2:Mm + 2, :].astype(bf16), wb1_ref[2],
                        preferred_element_type=f32)
    y1 = jnp.maximum(acc * s1_ref[0] + t1_ref[0], 0.0)   # bias+BN(eval)+ReLU
    y1b = y1.astype(bf16)                                 # layer-2 MXU operand

    # ---- stage layer-1 output with zero halos (H padding for layer 2) -------
    yp_ref[1:Mm + 1, :] = y1
    for e in range(Nb):
        r0 = e * Hp
        yp_ref[r0:r0 + 1, :] = jnp.zeros((1, WCout), f32)
        yp_ref[r0 + H + 1:r0 + H + 2, :] = jnp.zeros((1, WCout), f32)

    # ---- layer 2 -------------------------------------------------------------
    acc2 = jnp.dot(yp_ref[0:Mm, :].astype(bf16), wb2_ref[0],
                   preferred_element_type=f32)
    acc2 = acc2 + jnp.dot(y1b, wb2_ref[1],                # center tap reuses
                          preferred_element_type=f32)     # the live value
    acc2 = acc2 + jnp.dot(yp_ref[2:Mm + 2, :].astype(bf16), wb2_ref[2],
                          preferred_element_type=f32)
    y2 = jnp.maximum(acc2 * s2_ref[0] + t2_ref[0], 0.0)

    # ---- extract interior rows per element into the lane-dense output -------
    for e in range(Nb):
        o_ref[e] = y2[e * Hp:e * Hp + H, :].astype(o_ref.dtype)


def _band_weights(w_hwio, W):
    """(3,3,Cin,Cout) HWIO conv weights -> (3, W*Cin, W*Cout) band matrices.

    band[ky, ix*Cin+ci, x*Cout+co] = w[ky, ix-x+1, ci, co]  if |ix-x| <= 1
                                   = 0                      otherwise
    so that  y_row[h] = sum_ky  x_row[h+ky-1] @ band[ky]
    implements a 3x3 "same" convolution with the W-direction zero padding
    folded into the (mostly zero) band structure.
    """
    _, _, Cin, Cout = w_hwio.shape
    ix = jnp.arange(W)[:, None]            # input column
    x = jnp.arange(W)[None, :]             # output column
    kx = ix - x + 1                        # (W, W)
    valid = ((kx >= 0) & (kx < 3)).astype(w_hwio.dtype)
    band = w_hwio[:, jnp.clip(kx, 0, 2), :, :]          # (3, W, W, Cin, Cout)
    band = band * valid[None, :, :, None, None]
    band = jnp.transpose(band, (0, 1, 3, 2, 4))         # (3, W, Cin, W, Cout)
    return band.reshape(3, W * Cin, W * Cout)


def _pick_nb(n, h, target_rows=128):
    """Largest divisor of n with nb*h <= target_rows (at least 1)."""
    cap = max(1, target_rows // max(h, 1))
    nb = 1
    for d in range(1, min(n, cap) + 1):
        if n % d == 0:
            nb = d
    return nb


def conv_block_nhwc(x_nhwc, params, *, nb=None):
    """(Conv3x3 + BN(eval) + ReLU) x 2 on an NHWC input; single pallas_call.

    Preferred (transpose-free) entry point.
    """
    N, H, W, Cin = x_nhwc.shape
    Cout = params["w1"].shape[-1]
    WCin, WCout = W * Cin, W * Cout

    if nb is None:
        # Target M ~ 128 matmul rows per grid step (v5e MXU height; v6e/v7x
        # benefit further from 256, and keeping >=2 grid steps feeds both v7x
        # TensorCores when N is large enough).
        nb = _pick_nb(N, H)
    assert N % nb == 0, (N, nb)

    # Band (Toeplitz) weights (W padding folded into zeros), bf16 MXU operands.
    wb1 = _band_weights(params["w1"], W).astype(jnp.bfloat16)
    wb2 = _band_weights(params["w2"], W).astype(jnp.bfloat16)

    # Fold conv bias into BN shift; tile per-channel vectors over W so the f32
    # epilogue applies directly to the lane-dense (M, W*Cout) layout.
    def fold_tile(scale, shift, bias):
        shift = shift + bias * scale
        return (jnp.tile(scale, W).reshape(1, WCout).astype(jnp.float32),
                jnp.tile(shift, W).reshape(1, WCout).astype(jnp.float32))

    s1, t1 = fold_tile(params["scale1"], params["shift1"], params["b1"])
    s2, t2 = fold_tile(params["scale2"], params["shift2"], params["b2"])

    # Channels flattened onto the lane axis (free reshape: C is innermost);
    # bf16 activations halve the HBM read bytes.
    x2d = x_nhwc.reshape(N, H, WCin).astype(jnp.bfloat16)

    # NOTE: WCout % 128 == 0 here keeps output stores unmasked (lane-dense);
    # other Cout/W remain correct but degrade to masked partial stores.

    steps = N // nb
    mm = nb * (H + 2) - 2
    flops = steps * 2 * mm * 3 * (WCin * WCout + WCout * WCout)
    bytes_accessed = (N * H * WCin * 2            # bf16 activations in
                      + 3 * WCin * WCout * 2      # wb1 (bf16)
                      + 3 * WCout * WCout * 2     # wb2 (bf16)
                      + 4 * WCout * 4             # scales / shifts (f32)
                      + N * H * WCout * 4)        # f32 activations out
    cost = pl.CostEstimate(flops=flops, transcendentals=0,
                           bytes_accessed=bytes_accessed)

    out = pl.pallas_call(
        _fused_conv_block_kernel,
        out_shape=jax.ShapeDtypeStruct((N, H, WCout), jnp.float32),
        grid_spec=pltpu.PrefetchScalarGridSpec(
            num_scalar_prefetch=0,
            grid=(steps,),
            in_specs=[
                pl.BlockSpec((nb, H, WCin), lambda n: (n, 0, 0)),
                pl.BlockSpec((3, WCin, WCout), lambda n: (0, 0, 0)),
                pl.BlockSpec((1, WCout), lambda n: (0, 0)),
                pl.BlockSpec((1, WCout), lambda n: (0, 0)),
                pl.BlockSpec((3, WCout, WCout), lambda n: (0, 0, 0)),
                pl.BlockSpec((1, WCout), lambda n: (0, 0)),
                pl.BlockSpec((1, WCout), lambda n: (0, 0)),
            ],
            out_specs=pl.BlockSpec((nb, H, WCout), lambda n: (n, 0, 0)),
            scratch_shapes=[
                pltpu.VMEM((nb * (H + 2), WCin), jnp.float32),
                pltpu.VMEM((nb * (H + 2), WCout), jnp.float32),
            ],
        ),
        compiler_params=pltpu.CompilerParams(
            dimension_semantics=("parallel",),
            vmem_limit_bytes=32 * 1024 * 1024),
        cost_estimate=cost,
    )(x2d, wb1, s1, t1, wb2, s2, t2)

    return out.reshape(N, H, W, Cout).astype(x_nhwc.dtype)


def make_conv_block_params(key, ch_in, ch_out, eps=1e-5):
    """Deterministic parameter init matching the module's shapes."""
    k1, k2, k3, k4 = jax.random.split(key, 4)
    params = {}
    params["w1"] = jax.random.normal(k1, (3, 3, ch_in, ch_out), jnp.float32) * 0.1
    params["b1"] = jax.random.normal(k2, (ch_out,), jnp.float32) * 0.1
    params["w2"] = jax.random.normal(k3, (3, 3, ch_out, ch_out), jnp.float32) * 0.1
    params["b2"] = jax.random.normal(k4, (ch_out,), jnp.float32) * 0.1
    # BatchNorm eval-mode fold (PyTorch defaults: gamma=1, beta=0, mean=0, var=1)
    gamma = jnp.ones((ch_out,), jnp.float32)
    beta = jnp.zeros((ch_out,), jnp.float32)
    mean = jnp.zeros((ch_out,), jnp.float32)
    var = jnp.ones((ch_out,), jnp.float32)
    scale = gamma / jnp.sqrt(var + eps)
    shift = beta - mean * scale
    params["scale1"] = scale
    params["shift1"] = shift
    params["scale2"] = scale
    params["shift2"] = shift
    return params


@jax.jit
def conv_block_forward(x_nchw, params):
    # NCHW wrapper kept only for parity with the PyTorch module layout; each
    # transpose is an extra HBM round trip, so NHWC pipelines should call
    # conv_block_nhwc directly.
    x = jnp.transpose(x_nchw, (0, 2, 3, 1))       # NCHW -> NHWC
    y = conv_block_nhwc(x, params)                # fused two-layer kernel
    return jnp.transpose(y, (0, 3, 1, 2))         # NHWC -> NCHW


# ----------------------------- reference ------------------------------------
def _ref_layer(x_nchw, w_hwio, b, scale, shift):
    w_oihw = jnp.transpose(w_hwio, (3, 2, 0, 1))
    y = jax.lax.conv_general_dilated(
        x_nchw, w_oihw, window_strides=(1, 1), padding=((1, 1), (1, 1)),
        dimension_numbers=("NCHW", "OIHW", "NCHW"))
    y = y + b[None, :, None, None]
    y = y * scale[None, :, None, None] + shift[None, :, None, None]
    return jnp.maximum(y, 0.0)


def _ref_forward(x_nchw, p):
    y = _ref_layer(x_nchw, p["w1"], p["b1"], p["scale1"], p["shift1"])
    return _ref_layer(y, p["w2"], p["b2"], p["scale2"], p["shift2"])


if __name__ == "__main__":
    key = jax.random.PRNGKey(0)
    k_x, k_p = jax.random.split(key)

    ch_in, ch_out = 4, 8
    x = jax.random.normal(k_x, (2, ch_in, 16, 16), jnp.float32)  # NCHW
    params = make_conv_block_params(k_p, ch_in, ch_out)

    out = conv_block_forward(x, params)
    out = jax.block_until_ready(out)

    ref = _ref_forward(x, params)
    assert out.shape == (2, ch_out, 16, 16)
    # bf16 MXU operands (f32 accumulate/epilogue) -> relaxed tolerance vs the
    # f32 lax.conv reference.
    max_err = float(jnp.max(jnp.abs(out - ref)))
    assert jnp.allclose(out, ref, atol=2e-2, rtol=2e-2), max_err

    print("KERNEL_OK")
</pallas_src>

<mosaic_0001>
module attributes {stable_mosaic.version = 11 : i64} {
  func.func @_fused_conv_block_kernel(%arg0: i32, %arg1: memref<2x16x64xbf16, #tpu.memory_space<vmem>>, %arg2: memref<3x64x128xbf16, #tpu.memory_space<vmem>>, %arg3: memref<1x128xf32, #tpu.memory_space<vmem>>, %arg4: memref<1x128xf32, #tpu.memory_space<vmem>>, %arg5: memref<3x128x128xbf16, #tpu.memory_space<vmem>>, %arg6: memref<1x128xf32, #tpu.memory_space<vmem>>, %arg7: memref<1x128xf32, #tpu.memory_space<vmem>>, %arg8: memref<2x16x128xf32, #tpu.memory_space<vmem>>, %arg9: memref<36x64xf32, #tpu.memory_space<vmem>>, %arg10: memref<36x128xf32, #tpu.memory_space<vmem>>) attributes {dimension_semantics = [#tpu.dimension_semantics<parallel>], iteration_bounds = array<i64: 1>, scalar_prefetch = 0 : i64, scratch_operands = 2 : i64, tpu.core_type = #tpu.core_type<tc>, window_params = [{transform_indices = @transform_0, window_bounds = array<i64: 2, 16, 64>}, {pipeline_mode = #tpu.pipeline_mode<synchronous>, transform_indices = @transform_1, window_bounds = array<i64: 3, 64, 128>}, {pipeline_mode = #tpu.pipeline_mode<synchronous>, transform_indices = @transform_2, window_bounds = array<i64: 1, 128>}, {pipeline_mode = #tpu.pipeline_mode<synchronous>, transform_indices = @transform_3, window_bounds = array<i64: 1, 128>}, {pipeline_mode = #tpu.pipeline_mode<synchronous>, transform_indices = @transform_4, window_bounds = array<i64: 3, 128, 128>}, {pipeline_mode = #tpu.pipeline_mode<synchronous>, transform_indices = @transform_5, window_bounds = array<i64: 1, 128>}, {pipeline_mode = #tpu.pipeline_mode<synchronous>, transform_indices = @transform_6, window_bounds = array<i64: 1, 128>}, {transform_indices = @transform_7, window_bounds = array<i64: 2, 16, 128>}]} {
    %cst = arith.constant 0.000000e+00 : f32
    %0 = vector.broadcast %cst : f32 to vector<1x64xf32>
    %c0 = arith.constant 0 : index
    %c0_0 = arith.constant 0 : index
    %1 = vector.load %arg9[%c0, %c0_0] : memref<36x64xf32, #tpu.memory_space<vmem>>, vector<1x64xf32>
    tpu.vector_store %arg9[%c0, %c0_0], %0 {strides = array<i32>} : memref<36x64xf32, #tpu.memory_space<vmem>>, vector<1x64xf32>,
    %c0_1 = arith.constant 0 : index
    %c0_2 = arith.constant 0 : index
    %c0_3 = arith.constant 0 : index
    %2 = vector.load %arg1[%c0_1, %c0_2, %c0_3] : memref<2x16x64xbf16, #tpu.memory_space<vmem>>, vector<1x16x64xbf16>
    %3 = vector.shape_cast %2 : vector<1x16x64xbf16> to vector<16x64xbf16>
    %4 = arith.extf %3 : vector<16x64xbf16> to vector<16x64xf32>
    %c1 = arith.constant 1 : index
    %c0_4 = arith.constant 0 : index
    %5 = vector.load %arg9[%c1, %c0_4] : memref<36x64xf32, #tpu.memory_space<vmem>>, vector<16x64xf32>
    tpu.vector_store %arg9[%c1, %c0_4], %4 {strides = array<i32>} : memref<36x64xf32, #tpu.memory_space<vmem>>, vector<16x64xf32>,
    %cst_5 = arith.constant 0.000000e+00 : f32
    %6 = vector.broadcast %cst_5 : f32 to vector<1x64xf32>
    %c17 = arith.constant 17 : index
    %c0_6 = arith.constant 0 : index
    %7 = vector.load %arg9[%c17, %c0_6] : memref<36x64xf32, #tpu.memory_space<vmem>>, vector<1x64xf32>
    tpu.vector_store %arg9[%c17, %c0_6], %6 {strides = array<i32>} : memref<36x64xf32, #tpu.memory_space<vmem>>, vector<1x64xf32>,
    %cst_7 = arith.constant 0.000000e+00 : f32
    %8 = vector.broadcast %cst_7 : f32 to vector<1x64xf32>
    %c18 = arith.constant 18 : index
    %c0_8 = arith.constant 0 : index
    %9 = vector.load %arg9[%c18, %c0_8] : memref<36x64xf32, #tpu.memory_space<vmem>>, vector<1x64xf32>
    tpu.vector_store %arg9[%c18, %c0_8], %8 {strides = array<i32>} : memref<36x64xf32, #tpu.memory_space<vmem>>, vector<1x64xf32>,
    %c1_9 = arith.constant 1 : index
    %c0_10 = arith.constant 0 : index
    %c0_11 = arith.constant 0 : index
    %10 = vector.load %arg1[%c1_9, %c0_10, %c0_11] : memref<2x16x64xbf16, #tpu.memory_space<vmem>>, vector<1x16x64xbf16>
    %11 = vector.shape_cast %10 : vector<1x16x64xbf16> to vector<16x64xbf16>
    %12 = arith.extf %11 : vector<16x64xbf16> to vector<16x64xf32>
    %c19 = arith.constant 19 : index
    %c0_12 = arith.constant 0 : index
    %13 = vector.load %arg9[%c19, %c0_12] : memref<36x64xf32, #tpu.memory_space<vmem>>, vector<16x64xf32>
    tpu.vector_store %arg9[%c19, %c0_12], %12 {strides = array<i32>} : memref<36x64xf32, #tpu.memory_space<vmem>>, vector<16x64xf32>,
    %cst_13 = arith.constant 0.000000e+00 : f32
    %14 = vector.broadcast %cst_13 : f32 to vector<1x64xf32>
    %c35 = arith.constant 35 : index
    %c0_14 = arith.constant 0 : index
    %15 = vector.load %arg9[%c35, %c0_14] : memref<36x64xf32, #tpu.memory_space<vmem>>, vector<1x64xf32>
    tpu.vector_store %arg9[%c35, %c0_14], %14 {strides = array<i32>} : memref<36x64xf32, #tpu.memory_space<vmem>>, vector<1x64xf32>,
    %c0_15 = arith.constant 0 : index
    %c0_16 = arith.constant 0 : index
    %16 = vector.load %arg9[%c0_15, %c0_16] : memref<36x64xf32, #tpu.memory_space<vmem>>, vector<34x64xf32>
    %17 = arith.truncf %16 : vector<34x64xf32> to vector<34x64xbf16>
    %c0_17 = arith.constant 0 : index
    %c0_18 = arith.constant 0 : index
    %c0_19 = arith.constant 0 : index
    %18 = vector.load %arg2[%c0_17, %c0_18, %c0_19] : memref<3x64x128xbf16, #tpu.memory_space<vmem>>, vector<1x64x128xbf16>
    %19 = vector.shape_cast %18 : vector<1x64x128xbf16> to vector<64x128xbf16>
    %cst_20 = arith.constant dense<0.000000e+00> : vector<34x128xf32>
    %20 = tpu.matmul %17, %19, %cst_20 {dimension_numbers = #tpu.dot_dimension_numbers<[1], [0], [0], [1], [0, 0, 1, 1], [], []>} : vector<34x64xbf16>, vector<64x128xbf16>, vector<34x128xf32> -> vector<34x128xf32>
    %c1_21 = arith.constant 1 : index
    %c0_22 = arith.constant 0 : index
    %21 = vector.load %arg9[%c1_21, %c0_22] : memref<36x64xf32, #tpu.memory_space<vmem>>, vector<34x64xf32>
    %22 = arith.truncf %21 : vector<34x64xf32> to vector<34x64xbf16>
    %c1_23 = arith.constant 1 : index
    %c0_24 = arith.constant 0 : index
    %c0_25 = arith.constant 0 : index
    %23 = vector.load %arg2[%c1_23, %c0_24, %c0_25] : memref<3x64x128xbf16, #tpu.memory_space<vmem>>, vector<1x64x128xbf16>
    %24 = vector.shape_cast %23 : vector<1x64x128xbf16> to vector<64x128xbf16>
    %cst_26 = arith.constant dense<0.000000e+00> : vector<34x128xf32>
    %25 = tpu.matmul %22, %24, %cst_26 {dimension_numbers = #tpu.dot_dimension_numbers<[1], [0], [0], [1], [0, 0, 1, 1], [], []>} : vector<34x64xbf16>, vector<64x128xbf16>, vector<34x128xf32> -> vector<34x128xf32>
    %26 = arith.addf %20, %25 : vector<34x128xf32>
    %c2 = arith.constant 2 : index
    %c0_27 = arith.constant 0 : index
    %27 = vector.load %arg9[%c2, %c0_27] : memref<36x64xf32, #tpu.memory_space<vmem>>, vector<34x64xf32>
    %28 = arith.truncf %27 : vector<34x64xf32> to vector<34x64xbf16>
    %c2_28 = arith.constant 2 : index
    %c0_29 = arith.constant 0 : index
    %c0_30 = arith.constant 0 : index
    %29 = vector.load %arg2[%c2_28, %c0_29, %c0_30] : memref<3x64x128xbf16, #tpu.memory_space<vmem>>, vector<1x64x128xbf16>
    %30 = vector.shape_cast %29 : vector<1x64x128xbf16> to vector<64x128xbf16>
    %cst_31 = arith.constant dense<0.000000e+00> : vector<34x128xf32>
    %31 = tpu.matmul %28, %30, %cst_31 {dimension_numbers = #tpu.dot_dimension_numbers<[1], [0], [0], [1], [0, 0, 1, 1], [], []>} : vector<34x64xbf16>, vector<64x128xbf16>, vector<34x128xf32> -> vector<34x128xf32>
    %32 = arith.addf %26, %31 : vector<34x128xf32>
    %c0_32 = arith.constant 0 : index
    %c0_33 = arith.constant 0 : index
    %33 = vector.load %arg3[%c0_32, %c0_33] : memref<1x128xf32, #tpu.memory_space<vmem>>, vector<1x128xf32>
    %34 = vector.shape_cast %33 : vector<1x128xf32> to vector<128xf32>
    %35 = vector.shape_cast %34 : vector<128xf32> to vector<1x128xf32>
    %36 = vector.broadcast %35 : vector<1x128xf32> to vector<34x128xf32>
    %37 = arith.mulf %32, %36 : vector<34x128xf32>
    %c0_34 = arith.constant 0 : index
    %c0_35 = arith.constant 0 : index
    %38 = vector.load %arg4[%c0_34, %c0_35] : memref<1x128xf32, #tpu.memory_space<vmem>>, vector<1x128xf32>
    %39 = vector.shape_cast %38 : vector<1x128xf32> to vector<128xf32>
    %40 = vector.shape_cast %39 : vector<128xf32> to vector<1x128xf32>
    %41 = vector.broadcast %40 : vector<1x128xf32> to vector<34x128xf32>
    %42 = arith.addf %37, %41 : vector<34x128xf32>
    %cst_36 = arith.constant 0.000000e+00 : f32
    %43 = vector.broadcast %cst_36 : f32 to vector<34x128xf32>
    %44 = arith.maximumf %42, %43 : vector<34x128xf32>
    %45 = arith.truncf %44 : vector<34x128xf32> to vector<34x128xbf16>
    %c1_37 = arith.constant 1 : index
    %c0_38 = arith.constant 0 : index
    %46 = vector.load %arg10[%c1_37, %c0_38] : memref<36x128xf32, #tpu.memory_space<vmem>>, vector<34x128xf32>
    tpu.vector_store %arg10[%c1_37, %c0_38], %44 {strides = array<i32>} : memref<36x128xf32, #tpu.memory_space<vmem>>, vector<34x128xf32>,
    %cst_39 = arith.constant 0.000000e+00 : f32
    %47 = vector.broadcast %cst_39 : f32 to vector<1x128xf32>
    %c0_40 = arith.constant 0 : index
    %c0_41 = arith.constant 0 : index
    %48 = vector.load %arg10[%c0_40, %c0_41] : memref<36x128xf32, #tpu.memory_space<vmem>>, vector<1x128xf32>
    tpu.vector_store %arg10[%c0_40, %c0_41], %47 {strides = array<i32>} : memref<36x128xf32, #tpu.memory_space<vmem>>, vector<1x128xf32>,
    %cst_42 = arith.constant 0.000000e+00 : f32
    %49 = vector.broadcast %cst_42 : f32 to vector<1x128xf32>
    %c17_43 = arith.constant 17 : index
    %c0_44 = arith.constant 0 : index
    %50 = vector.load %arg10[%c17_43, %c0_44] : memref<36x128xf32, #tpu.memory_space<vmem>>, vector<1x128xf32>
    tpu.vector_store %arg10[%c17_43, %c0_44], %49 {strides = array<i32>} : memref<36x128xf32, #tpu.memory_space<vmem>>, vector<1x128xf32>,
    %cst_45 = arith.constant 0.000000e+00 : f32
    %51 = vector.broadcast %cst_45 : f32 to vector<1x128xf32>
    %c18_46 = arith.constant 18 : index
    %c0_47 = arith.constant 0 : index
    %52 = vector.load %arg10[%c18_46, %c0_47] : memref<36x128xf32, #tpu.memory_space<vmem>>, vector<1x128xf32>
    tpu.vector_store %arg10[%c18_46, %c0_47], %51 {strides = array<i32>} : memref<36x128xf32, #tpu.memory_space<vmem>>, vector<1x128xf32>,
    %cst_48 = arith.constant 0.000000e+00 : f32
    %53 = vector.broadcast %cst_48 : f32 to vector<1x128xf32>
    %c35_49 = arith.constant 35 : index
    %c0_50 = arith.constant 0 : index
    %54 = vector.load %arg10[%c35_49, %c0_50] : memref<36x128xf32, #tpu.memory_space<vmem>>, vector<1x128xf32>
    tpu.vector_store %arg10[%c35_49, %c0_50], %53 {strides = array<i32>} : memref<36x128xf32, #tpu.memory_space<vmem>>, vector<1x128xf32>,
    %c0_51 = arith.constant 0 : index
    %c0_52 = arith.constant 0 : index
    %55 = vector.load %arg10[%c0_51, %c0_52] : memref<36x128xf32, #tpu.memory_space<vmem>>, vector<34x128xf32>
    %56 = arith.truncf %55 : vector<34x128xf32> to vector<34x128xbf16>
    %c0_53 = arith.constant 0 : index
    %c0_54 = arith.constant 0 : index
    %c0_55 = arith.constant 0 : index
    %57 = vector.load %arg5[%c0_53, %c0_54, %c0_55] : memref<3x128x128xbf16, #tpu.memory_space<vmem>>, vector<1x128x128xbf16>
    %58 = vector.shape_cast %57 : vector<1x128x128xbf16> to vector<128x128xbf16>
    %cst_56 = arith.constant dense<0.000000e+00> : vector<34x128xf32>
    %59 = tpu.matmul %56, %58, %cst_56 {dimension_numbers = #tpu.dot_dimension_numbers<[1], [0], [0], [1], [0, 0, 1, 1], [], []>} : vector<34x128xbf16>, vector<128x128xbf16>, vector<34x128xf32> -> vector<34x128xf32>
    %c1_57 = arith.constant 1 : index
    %c0_58 = arith.constant 0 : index
    %c0_59 = arith.constant 0 : index
    %60 = vector.load %arg5[%c1_57, %c0_58, %c0_59] : memref<3x128x128xbf16, #tpu.memory_space<vmem>>, vector<1x128x128xbf16>
    %61 = vector.shape_cast %60 : vector<1x128x128xbf16> to vector<128x128xbf16>
    %cst_60 = arith.constant dense<0.000000e+00> : vector<34x128xf32>
    %62 = tpu.matmul %45, %61, %cst_60 {dimension_numbers = #tpu.dot_dimension_numbers<[1], [0], [0], [1], [0, 0, 1, 1], [], []>} : vector<34x128xbf16>, vector<128x128xbf16>, vector<34x128xf32> -> vector<34x128xf32>
    %63 = arith.addf %59, %62 : vector<34x128xf32>
    %c2_61 = arith.constant 2 : index
    %c0_62 = arith.constant 0 : index
    %64 = vector.load %arg10[%c2_61, %c0_62] : memref<36x128xf32, #tpu.memory_space<vmem>>, vector<34x128xf32>
    %65 = arith.truncf %64 : vector<34x128xf32> to vector<34x128xbf16>
    %c2_63 = arith.constant 2 : index
    %c0_64 = arith.constant 0 : index
    %c0_65 = arith.constant 0 : index
    %66 = vector.load %arg5[%c2_63, %c0_64, %c0_65] : memref<3x128x128xbf16, #tpu.memory_space<vmem>>, vector<1x128x128xbf16>
    %67 = vector.shape_cast %66 : vector<1x128x128xbf16> to vector<128x128xbf16>
    %cst_66 = arith.constant dense<0.000000e+00> : vector<34x128xf32>
    %68 = tpu.matmul %65, %67, %cst_66 {dimension_numbers = #tpu.dot_dimension_numbers<[1], [0], [0], [1], [0, 0, 1, 1], [], []>} : vector<34x128xbf16>, vector<128x128xbf16>, vector<34x128xf32> -> vector<34x128xf32>
    %69 = arith.addf %63, %68 : vector<34x128xf32>
    %c0_67 = arith.constant 0 : index
    %c0_68 = arith.constant 0 : index
    %70 = vector.load %arg6[%c0_67, %c0_68] : memref<1x128xf32, #tpu.memory_space<vmem>>, vector<1x128xf32>
    %71 = vector.shape_cast %70 : vector<1x128xf32> to vector<128xf32>
    %72 = vector.shape_cast %71 : vector<128xf32> to vector<1x128xf32>
    %73 = vector.broadcast %72 : vector<1x128xf32> to vector<34x128xf32>
    %74 = arith.mulf %69, %73 : vector<34x128xf32>
    %c0_69 = arith.constant 0 : index
    %c0_70 = arith.constant 0 : index
    %75 = vector.load %arg7[%c0_69, %c0_70] : memref<1x128xf32, #tpu.memory_space<vmem>>, vector<1x128xf32>
    %76 = vector.shape_cast %75 : vector<1x128xf32> to vector<128xf32>
    %77 = vector.shape_cast %76 : vector<128xf32> to vector<1x128xf32>
    %78 = vector.broadcast %77 : vector<1x128xf32> to vector<34x128xf32>
    %79 = arith.addf %74, %78 : vector<34x128xf32>
    %cst_71 = arith.constant 0.000000e+00 : f32
    %80 = vector.broadcast %cst_71 : f32 to vector<34x128xf32>
    %81 = arith.maximumf %79, %80 : vector<34x128xf32>
    %82 = vector.extract_strided_slice %81 {offsets = [0, 0], sizes = [16, 128], strides = [1, 1]} : vector<34x128xf32> to vector<16x128xf32>
    %c0_72 = arith.constant 0 : index
    %c0_73 = arith.constant 0 : index
    %c0_74 = arith.constant 0 : index
    %83 = vector.load %arg8[%c0_72, %c0_73, %c0_74] : memref<2x16x128xf32, #tpu.memory_space<vmem>>, vector<1x16x128xf32>
    %84 = vector.shape_cast %83 : vector<1x16x128xf32> to vector<16x128xf32>
    %85 = vector.shape_cast %82 : vector<16x128xf32> to vector<1x16x128xf32>
    tpu.vector_store %arg8[%c0_72, %c0_73, %c0_74], %85 {strides = array<i32>} : memref<2x16x128xf32, #tpu.memory_space<vmem>>, vector<1x16x128xf32>,
    %86 = vector.extract_strided_slice %81 {offsets = [18, 0], sizes = [16, 128], strides = [1, 1]} : vector<34x128xf32> to vector<16x128xf32>
    %c1_75 = arith.constant 1 : index
    %c0_76 = arith.constant 0 : index
    %c0_77 = arith.constant 0 : index
    %87 = vector.load %arg8[%c1_75, %c0_76, %c0_77] : memref<2x16x128xf32, #tpu.memory_space<vmem>>, vector<1x16x128xf32>
    %88 = vector.shape_cast %87 : vector<1x16x128xf32> to vector<16x128xf32>
    %89 = vector.shape_cast %86 : vector<16x128xf32> to vector<1x16x128xf32>
    tpu.vector_store %arg8[%c1_75, %c0_76, %c0_77], %89 {strides = array<i32>} : memref<2x16x128xf32, #tpu.memory_space<vmem>>, vector<1x16x128xf32>,
    return
  }
  func.func @transform_0(%arg0: i32) -> (i32, i32, i32) {
    %c0_i32 = arith.constant 0 : i32
    %c0_i32_0 = arith.constant 0 : i32
    %c0_i32_1 = arith.constant 0 : i32
    return %arg0, %c0_i32, %c0_i32_0 : i32, i32, i32
  }
  func.func @transform_1(%arg0: i32) -> (i32, i32, i32) {
    %c0_i32 = arith.constant 0 : i32
    %c0_i32_0 = arith.constant 0 : i32
    %c0_i32_1 = arith.constant 0 : i32
    %c0_i32_2 = arith.constant 0 : i32
    return %c0_i32, %c0_i32_0, %c0_i32_1 : i32, i32, i32
  }
  func.func @transform_2(%arg0: i32) -> (i32, i32) {
    %c0_i32 = arith.constant 0 : i32
    %c0_i32_0 = arith.constant 0 : i32
    %c0_i32_1 = arith.constant 0 : i32
    return %c0_i32, %c0_i32_0 : i32, i32
  }
  func.func @transform_3(%arg0: i32) -> (i32, i32) {
    %c0_i32 = arith.constant 0 : i32
    %c0_i32_0 = arith.constant 0 : i32
    %c0_i32_1 = arith.constant 0 : i32
    return %c0_i32, %c0_i32_0 : i32, i32
  }
  func.func @transform_4(%arg0: i32) -> (i32, i32, i32) {
    %c0_i32 = arith.constant 0 : i32
    %c0_i32_0 = arith.constant 0 : i32
    %c0_i32_1 = arith.constant 0 : i32
    %c0_i32_2 = arith.constant 0 : i32
    return %c0_i32, %c0_i32_0, %c0_i32_1 : i32, i32, i32
  }
  func.func @transform_5(%arg0: i32) -> (i32, i32) {
    %c0_i32 = arith.constant 0 : i32
    %c0_i32_0 = arith.constant 0 : i32
    %c0_i32_1 = arith.constant 0 : i32
    return %c0_i32, %c0_i32_0 : i32, i32
  }
  func.func @transform_6(%arg0: i32) -> (i32, i32) {
    %c0_i32 = arith.constant 0 : i32
    %c0_i32_0 = arith.constant 0 : i32
    %c0_i32_1 = arith.constant 0 : i32
    return %c0_i32, %c0_i32_0 : i32, i32
  }
  func.func @transform_7(%arg0: i32) -> (i32, i32, i32) {
    %c0_i32 = arith.constant 0 : i32
    %c0_i32_0 = arith.constant 0 : i32
    %c0_i32_1 = arith.constant 0 : i32
    return %arg0, %c0_i32, %c0_i32_0 : i32, i32, i32
  }
}

</mosaic_0001>

<bundles_post_ra>
// kernel: tile.28
= control target key start
LH: loop header
LB: loop body
LE: loop exit
PB: predicated region body
PF: predicated region fallthrough
CT: control target
= control target key end

     0   :  { %s28_s0 = inlined_call_operand.vmem [shape: f32[8], index: 0, kind: input, shape index: {}]   ;;  %s29_s1 = inlined_call_operand.vmem [shape: f32[16,8], index: 1, kind: output, shape index: {}]  }
   0x1   :  { %v4_v0 = vld [vmem:[%s28_s0] ss:$0 sm:$0xff] }
   0x2   :  { %5 = vst [vmem:[%s29_s1] sm:$0xff] %v4_v0 }
   0x3   :  { %8 = vst [vmem:[%s29_s1 + $0x8] sm:$0xff] %v4_v0 }

// kernel: tile.29
= control target key start
LH: loop header
LB: loop body
LE: loop exit
PB: predicated region body
PF: predicated region fallthrough
CT: control target
= control target key end

     0   :  { %s131_s10 = smov 120   ;;  %s132_s11 = smov 104   ;;  %vm3_vm0 = vcmask 64512   ;;  %vm9_vm1 = vcmask 1048512   ;;  %vm15_vm2 = vcmask 982912   ;;  %vm21_vm3 = vcmask 917312   ;;  %s207_s0 = inlined_call_operand.vmem [shape: f32[16,8], index: 0, kind: input, shape index: {}]   ;;  %s208_s1 = inlined_call_operand.vmem [shape: f32[1,128], index: 1, kind: output, shape index: {}]  }
   0x1   :  { %v101_v0 = vld [vmem:[%s207_s0 + $0xf] sm:$0x1]   ;;  %v103_v1 = vld [vmem:[%s207_s0 + $0xd] sm:$0x1]   ;;  %v105_v2 = vld [vmem:[%s207_s0 + $0xb] sm:$0x1]  }
   0x2   :  { %7 = vrot.lane.b32.xlu0 %v101_v0, %s131_s10  ;;  %19 = vrot.lane.b32.xlu1 %v103_v1, %s132_s11  ;;  %s133_s14 = smov 88   ;;  %v102_v3 = vld [vmem:[%s207_s0 + $0xe] sm:$0x1]   ;;  %v104_v4 = vld [vmem:[%s207_s0 + $0xc] sm:$0x1]   ;;  %s134_s19 = smov 112  }
   0x3   :  { %31 = vrot.lane.b32.xlu2 %v105_v2, %s133_s14  ;;  %s135_s20 = smov 96   ;;  %v106_v5 = vld [vmem:[%s207_s0 + $0xa] sm:$0x1]   ;;  %s136_s23 = smov 80   ;;  %v107_v6 = vld [vmem:[%s207_s0 + $0x9] sm:$0x1]  }
   0x4   :  { %v108_v7 = vld [vmem:[%s207_s0 + $0x8] sm:$0x1]   ;;  %s137_s28 = smov 72   ;;  %s138_s29 = smov 64   ;;  %v109_v8 = vld [vmem:[%s207_s0 + $0x7] sm:$0x1]  }
   0x5   :  { %s139_s3 = smov 56   ;;  %v110_v9 = vld [vmem:[%s207_s0 + $0x6] sm:$0x1]   ;;  %v111_v10 = vld [vmem:[%s207_s0 + $0x5] sm:$0x1]   ;;  %s140_s8 = smov 48  }
   0x6   :  { %s141_s9 = smov 40   ;;  %v112_v11 = vld [vmem:[%s207_s0 + $0x4] sm:$0x1]   ;;  %s142_s12 = smov 32   ;;  %v113_v12 = vld [vmem:[%s207_s0 + $0x3] sm:$0x1]  }
   0x7   :  { %v114_v13 = vld [vmem:[%s207_s0 + $0x2] sm:$0x1]   ;;  %s143_s17 = smov 24   ;;  %s144_s18 = smov 16   ;;  %v115_v14 = vld [vmem:[%s207_s0 + $0x1] sm:$0x1]  }
   0x8   :  { %s145_s21 = smov 8   ;;  %v2_v15 = vld [vmem:[%s207_s0] sm:$0x1]   ;;  %vm27_vm4 = vcmask 851712   ;;  %vm33_vm5 = vcmask 786112   ;;  %vm39_vm6 = vcmask 720512  }
   0x9   :  { %4 = vst.msk [vmem:[#allocation0] sm:$0x1] %vm3_vm0, %v2_v15   ;;  %vm45_vm7 = vcmask 654912   ;;  %vm51_vm8 = vcmask 589312   ;;  %vm57_vm9 = vcmask 523712   ;;  %vm63_vm10 = vcmask 458112  }
   0xa   :  { %13 = vrot.lane.b32.xlu0 %v102_v3, %s134_s19  ;;  %25 = vrot.lane.b32.xlu1 %v104_v4, %s135_s20  ;;  %vm69_vm11 = vcmask 392512   ;;  %vm75_vm12 = vcmask 326912   ;;  %vm81_vm13 = vcmask 261312   ;;  %vm87_vm14 = vcmask 195712  }
   0xb   :  { %37 = vrot.lane.b32.xlu2 %v106_v5, %s136_s23  ;;  %vm93_vm15 = vcmask 130112  }
  0x12   :  { %43 = vrot.lane.b32.xlu0 %v107_v6, %s137_s28  ;;  %49 = vrot.lane.b32.xlu1 %v108_v7, %s138_s29 }
  0x13   :  { %55 = vrot.lane.b32.xlu2 %v109_v8, %s139_s3 }
  0x1a   :  { %61 = vrot.lane.b32.xlu0 %v110_v9, %s140_s8  ;;  %67 = vrot.lane.b32.xlu1 %v111_v10, %s141_s9 }
  0x1b   :  { %73 = vrot.lane.b32.xlu2 %v112_v11, %s142_s12 }
  0x22   :  { %79 = vrot.lane.b32.xlu0 %v113_v12, %s143_s17  ;;  %85 = vrot.lane.b32.xlu1 %v114_v13, %s144_s18 }
  0x23   :  { %91 = vrot.lane.b32.xlu2 %v115_v14, %s145_s21 }
  0x5d   :  { %v32_v16 = vpop.permute.xlu2 %31  }
  0x65   :  { %v38_v17 = vpop.permute.xlu2 %37  }
  0x6d   :  { %v56_v18 = vpop.permute.xlu2 %55  }
  0x74   :  { %v8_v19 = vpop.permute.xlu0 %7   ;;  %v20_v20 = vpop.permute.xlu1 %19  }
  0x75   :  { %10 = vst.msk [vmem:[#allocation0] sm:$0x1] %vm9_vm1, %v8_v19   ;;  %v74_v21 = vpop.permute.xlu2 %73  }
  0x7c   :  { %v14_v22 = vpop.permute.xlu0 %13   ;;  %v26_v23 = vpop.permute.xlu1 %25  }
  0x7d   :  { %16 = vst.msk [vmem:[#allocation0] sm:$0x1] %vm15_vm2, %v14_v22   ;;  %v92_v24 = vpop.permute.xlu2 %91  }
  0x7e   :  { %22 = vst.msk [vmem:[#allocation0] sm:$0x1] %vm21_vm3, %v20_v20  }
  0x7f   :  { %28 = vst.msk [vmem:[#allocation0] sm:$0x1] %vm27_vm4, %v26_v23  }
  0x80   :  { %34 = vst.msk [vmem:[#allocation0] sm:$0x1] %vm33_vm5, %v32_v16  }
  0x81   :  { %40 = vst.msk [vmem:[#allocation0] sm:$0x1] %vm39_vm6, %v38_v17  }
  0x84   :  { %v44_v25 = vpop.permute.xlu0 %43   ;;  %v50_v26 = vpop.permute.xlu1 %49  }
  0x85   :  { %46 = vst.msk [vmem:[#allocation0] sm:$0x1] %vm45_vm7, %v44_v25  }
  0x86   :  { %52 = vst.msk [vmem:[#allocation0] sm:$0x1] %vm51_vm8, %v50_v26  }
  0x87   :  { %58 = vst.msk [vmem:[#allocation0] sm:$0x1] %vm57_vm9, %v56_v18  }
  0x8c   :  { %v62_v27 = vpop.permute.xlu0 %61   ;;  %v68_v28 = vpop.permute.xlu1 %67  }
  0x8d   :  { %64 = vst.msk [vmem:[#allocation0] sm:$0x1] %vm63_vm10, %v62_v27  }
  0x8e   :  { %70 = vst.msk [vmem:[#allocation0] sm:$0x1] %vm69_vm11, %v68_v28  }
  0x8f   :  { %76 = vst.msk [vmem:[#allocation0] sm:$0x1] %vm75_vm12, %v74_v21  }
  0x94   :  { %v80_v29 = vpop.permute.xlu0 %79   ;;  %v86_v30 = vpop.permute.xlu1 %85  }
  0x95   :  { %82 = vst.msk [vmem:[#allocation0] sm:$0x1] %vm81_vm13, %v80_v29  }
  0x96   :  { %88 = vst.msk [vmem:[#allocation0] sm:$0x1] %vm87_vm14, %v86_v30  }
  0x97   :  { %94 = vst.msk [vmem:[#allocation0] sm:$0x1] %vm93_vm15, %v92_v24  }
  0x9e   :  { %v97_v31 = vld [vmem:[#allocation0] sm:$0x1] }
  0x9f   :  { %100 = vst [vmem:[%s208_s1] sm:$0x1] %v97_v31 }

// kernel: conv_block_forward.1
= control target key start
LH: loop header
LB: loop body
LE: loop exit
PB: predicated region body
PF: predicated region fallthrough
CT: control target
= control target key end

     0   :  { %vm33_vm0 = vcmask 523264   ;;  %vm27_vm1 = vcmask 516096   ;;  %v885_v5 = vmov 0.0   ;;  %s1095_s1 = inlined_call_operand.vmem [shape: bf16[3,64,128], index: 1, kind: input, shape index: {}]   ;;  %s1096_s0 = inlined_call_operand.vmem [shape: bf16[2,16,64], index: 0, kind: input, shape index: {}]   ;;  %s1097_s2 = inlined_call_operand.vmem [shape: f32[1,128], index: 2, kind: input, shape index: {}]   ;;  %s1098_s3 = inlined_call_operand.vmem [shape: f32[1,128], index: 3, kind: input, shape index: {}]   ;;  %s1099_s4 = inlined_call_operand.vmem [shape: bf16[3,128,128], index: 4, kind: input, shape index: {}]   ;;  %s1100_s5 = inlined_call_operand.vmem [shape: f32[1,128], index: 5, kind: input, shape index: {}]   ;;  %s1101_s6 = inlined_call_operand.vmem [shape: f32[1,128], index: 6, kind: input, shape index: {}]   ;;  %s1102_s7 = inlined_call_operand.vmem [shape: f32[2,16,128], index: 7, kind: output, shape index: {}]  }
   0x1   :  { %v834_v0 = vld [vmem:[%s1095_s1 + $0x38] sm:$0xff]  ;;  %v871_v1 = vld [vmem:[%s1096_s0 + $0x8] sm:$0xff]   ;;  %v833_v3 = vld [vmem:[%s1095_s1 + $0x30] sm:$0xff]  ;;  %28 = vst.msk [vmem:[#allocation2] sm:$0x1] %vm27_vm1, %v885_v5 }
   0x2   :  { %v830_v2 = vld [vmem:[%s1095_s1 + $0x18] sm:$0xff]  ;;  %872 = vmatpush.bf16.msra.mxu2 %v834_v0  ;;  %v870_v4 = vunpack.c.h.bf16 %v871_v1  ;;  %116 = vmatpush.bf16.msra.mxu0 %v834_v0  ;;  %v864_v6 = vld [vmem:[%s1096_s0] sm:$0xff]   ;;  %v829_v7 = vld [vmem:[%s1095_s1 + $0x10] sm:$0xff]  ;;  %36 = vst.msk [vmem:[#allocation2 + $0x11] sm:$0x1] %vm27_vm1, %v885_v5  ;;  %v869_v22 = vunpack.c.l.bf16 %v871_v1 }
   0x3   :  { %172 = vmatpush.bf16.msra.mxu1 %v830_v2  ;;  %v865_v8 = vunpack.c.l.bf16 %v864_v6  ;;  %v866_v9 = vunpack.c.h.bf16 %v864_v6  ;;  %v832_v10 = vld [vmem:[%s1095_s1 + $0x28] sm:$0xff]  ;;  %37 = vst.msk [vmem:[#allocation2 + $0x12] sm:$0x1] %vm27_vm1, %v885_v5  ;;  %v831_v12 = vld [vmem:[%s1095_s1 + $0x20] sm:$0xff]  ;;  %v838_v23 = vld [vmem:[%s1095_s1 + $0x58] sm:$0xff] }
   0x4   :  { %44 = vst.msk [vmem:[#allocation2 + $0x1b] sm:$0xff] %vm33_vm0, %v870_v4  ;;  %v828_v11 = vld [vmem:[%s1095_s1 + $0x8] sm:$0xff]  ;;  %v827_v15 = vld [vmem:[%s1095_s1] sm:$0xff]  ;;  %v837_v29 = vld [vmem:[%s1095_s1 + $0x50] sm:$0xff] }
   0x5   :  { %34 = vst.msk [vmem:[#allocation2 + $0x1] sm:$0xff] %vm33_vm0, %v865_v8  ;;  %v836_v33 = vld [vmem:[%s1095_s1 + $0x48] sm:$0xff]  ;;  %v835_v34 = vld [vmem:[%s1095_s1 + $0x40] sm:$0xff]  ;;  %v854_v43 = vld [vmem:[%s1099_s4 + $0x78] sm:$0xff] }
   0x6   :  { %873 = vmatpush.bf16.msra.mxu2 %v833_v3  ;;  %117 = vmatpush.bf16.msra.mxu0 %v833_v3  ;;  %35 = vst.msk [vmem:[#allocation2 + $0x9] sm:$0xff] %vm33_vm0, %v866_v9  ;;  %v853_v44 = vld [vmem:[%s1099_s4 + $0x70] sm:$0xff]  ;;  %v852_v45 = vld [vmem:[%s1099_s4 + $0x68] sm:$0xff]  ;;  %v846_v46 = vld [vmem:[%s1099_s4 + $0x38] sm:$0xff] }
   0x7   :  { %173 = vmatpush.bf16.msra.mxu1 %v829_v7  ;;  %45 = vst.msk [vmem:[#allocation2 + $0x23] sm:$0x1] %vm27_vm1, %v885_v5  ;;  %393 = vmatpush.bf16.msra.mxu3 %v854_v43  ;;  %v851_v47 = vld [vmem:[%s1099_s4 + $0x60] sm:$0xff]  ;;  %v845_v48 = vld [vmem:[%s1099_s4 + $0x30] sm:$0xff]  ;;  %v850_v50 = vld [vmem:[%s1099_s4 + $0x58] sm:$0xff] }
   0x8   :  { %300 = vst [vmem:[#allocation3] sm:$0x1] %v885_v5  ;;  %v844_v51 = vld [vmem:[%s1099_s4 + $0x28] sm:$0xff]  ;;  %v862_v52 = vld [vmem:[%s1099_s4 + $0xb8] sm:$0xff]  ;;  %v849_v53 = vld [vmem:[%s1099_s4 + $0x50] sm:$0xff] }
   0x9   :  { %303 = vst [vmem:[#allocation3 + $0x23] sm:$0x1] %v885_v5  ;;  %v843_v54 = vld [vmem:[%s1099_s4 + $0x20] sm:$0xff]  ;;  %v861_v55 = vld [vmem:[%s1099_s4 + $0xb0] sm:$0xff]  ;;  %v848_v57 = vld [vmem:[%s1099_s4 + $0x48] sm:$0xff] }
   0xa   :  { %874 = vmatpush.bf16.msra.mxu2 %v832_v10  ;;  %118 = vmatpush.bf16.msra.mxu0 %v832_v10  ;;  %43 = vst.msk [vmem:[#allocation2 + $0x13] sm:$0xff] %vm33_vm0, %v869_v22  ;;  %v842_v58 = vld [vmem:[%s1099_s4 + $0x18] sm:$0xff]  ;;  %v860_v59 = vld [vmem:[%s1099_s4 + $0xa8] sm:$0xff]  ;;  %v847_v60 = vld [vmem:[%s1099_s4 + $0x40] sm:$0xff] }
   0xb   :  { %v66_v13 = vld [vmem:[#allocation2 + $0x21] sm:$0x3]  ;;  %174 = vmatpush.bf16.msra.mxu1 %v828_v11  ;;  %394 = vmatpush.bf16.msra.mxu3 %v853_v44  ;;  %v841_v61 = vld [vmem:[%s1099_s4 + $0x10] sm:$0xff]  ;;  %v840_v0 = vld [vmem:[%s1099_s4 + $0x8] sm:$0xff] }
   0xc   :  { %v69_v14 = vpack.c.bf16 %v66_v13, %v66_v13  ;;  %v62_v16 = vld [vmem:[#allocation2 + $0x1] sm:$0xff]  ;;  %v858_v1 = vld [vmem:[%s1099_s4 + $0x98] sm:$0xff]  ;;  %v857_v6 = vld [vmem:[%s1099_s4 + $0x90] sm:$0xff] }
   0xd   :  { %v46_v17 = vld [vmem:[#allocation2] sm:$0xff]  ;;  %v63_v18 = vld [vmem:[#allocation2 + $0x9] sm:$0xff] }
   0xe   :  { %875 = vmatpush.bf16.msra.mxu2 %v831_v12  ;;  %119 = vmatpush.bf16.msra.mxu0 %v831_v12  ;;  %v47_v19 = vld [vmem:[#allocation2 + $0x8] sm:$0xff]  ;;  %v67_v20 = vpack.c.bf16 %v63_v18, %v62_v16  ;;  %v50_v24 = vld [vmem:[#allocation2 + $0x20] sm:$0x3]  ;;  %v195_v41 = vld [vmem:[#allocation2 + $0x22] sm:$0x3] }
   0xf   :  { %175 = vmatpush.bf16.msra.mxu1 %v827_v15  ;;  %v51_v21 = vpack.c.bf16 %v47_v19, %v46_v17  ;;  %v53_v30 = vpack.c.bf16 %v50_v24, %v50_v24  ;;  %v191_v35 = vld [vmem:[#allocation2 + $0x2] sm:$0xff]  ;;  %v192_v36 = vld [vmem:[#allocation2 + $0xa] sm:$0xff]  ;;  %v198_v42 = vpack.c.bf16 %v195_v41, %v195_v41  ;;  %395 = vmatpush.bf16.msra.mxu3 %v852_v45  ;;  %v882_v16 = vld [vmem:[%s1098_s3] ss:$0 sm:$0xff] }
  0x10   :  { %v196_v37 = vpack.c.bf16 %v192_v36, %v191_v35  ;;  %v859_v62 = vld [vmem:[%s1099_s4 + $0xa0] sm:$0xff]  ;;  %v856_v8 = vld [vmem:[%s1099_s4 + $0x88] sm:$0xff] }
  0x11   :  { %649 = vmatmul.msk.bf16.vlgmr.msra.gmra.mxu2 %vm33_vm0, %v69_v14  ;;  %647 = vmatmul.msk.bf16.vlgmr.msra.gmra.mxu0 %vm33_vm0, %v67_v20  ;;  %v64_v25 = vld [vmem:[#allocation2 + $0x11] sm:$0xff]  ;;  %v65_v26 = vld [vmem:[#allocation2 + $0x19] sm:$0xff] }
  0x12   :  { %876 = vmatpush.bf16.msrb.mxu2 %v830_v2  ;;  %666 = vmatmul.msk.bf16.vlgmr.msra.gmra.mxu1 %vm33_vm0, %v51_v21  ;;  %v48_v27 = vld [vmem:[#allocation2 + $0x10] sm:$0xff]  ;;  %v49_v28 = vld [vmem:[#allocation2 + $0x18] sm:$0xff]  ;;  %v68_v31 = vpack.c.bf16 %v65_v26, %v64_v25  ;;  %v839_v4 = vld [vmem:[%s1099_s4] sm:$0xff] }
  0x13   :  { %v52_v32 = vpack.c.bf16 %v49_v28, %v48_v27  ;;  %v193_v38 = vld [vmem:[#allocation2 + $0x12] sm:$0xff]  ;;  %v194_v39 = vld [vmem:[#allocation2 + $0x1a] sm:$0xff]  ;;  %464 = vmatpush.bf16.msrb.mxu0 %v846_v46  ;;  %396 = vmatpush.bf16.msra.mxu3 %v851_v47 }
  0x14   :  { %v197_v40 = vpack.c.bf16 %v194_v39, %v193_v38  ;;  %560 = vmatpush.bf16.msrb.mxu1 %v862_v52  ;;  %v855_v12 = vld [vmem:[%s1099_s4 + $0x80] sm:$0xff] }
  0x16   :  { %877 = vmatpush.bf16.msrb.mxu2 %v829_v7 }
  0x17   :  { %465 = vmatpush.bf16.msrb.mxu0 %v845_v48  ;;  %397 = vmatpush.bf16.msra.mxu3 %v850_v50 }
  0x18   :  { %561 = vmatpush.bf16.msrb.mxu1 %v861_v55 }
  0x1a   :  { %878 = vmatpush.bf16.msrb.mxu2 %v828_v11  ;;  %v881_v11 = vld [vmem:[%s1097_s2] ss:$0 sm:$0xff] }
  0x1b   :  { %466 = vmatpush.bf16.msrb.mxu0 %v844_v51  ;;  %398 = vmatpush.bf16.msra.mxu3 %v849_v53 }
  0x1c   :  { %562 = vmatpush.bf16.msrb.mxu1 %v860_v59 }
  0x1e   :  { %879 = vmatpush.bf16.msrb.mxu2 %v827_v15 }
  0x1f   :  { %467 = vmatpush.bf16.msrb.mxu0 %v843_v54  ;;  %399 = vmatpush.bf16.msra.mxu3 %v848_v57 }
  0x20   :  { %563 = vmatpush.bf16.msrb.mxu1 %v859_v62 }
  0x21   :  { %668 = vmatmul.msk.bf16.vlgmr.msrb.gmra.mxu2 %vm33_vm0, %v53_v30  ;;  %648 = vmatmul.msk.bf16.gmra.mxu0 %vm33_vm0, %v68_v31 }
  0x22   :  { %245 = vmatpush.bf16.msra.mxu2 %v838_v23  ;;  %667 = vmatmul.msk.bf16.gmra.mxu1 %vm33_vm0, %v52_v32 }
  0x23   :  { %468 = vmatpush.bf16.msrb.mxu0 %v842_v58  ;;  %400 = vmatpush.bf16.msra.mxu3 %v847_v60 }
  0x24   :  { %564 = vmatpush.bf16.msrb.mxu1 %v858_v1 }
  0x26   :  { %246 = vmatpush.bf16.msra.mxu2 %v837_v29 }
  0x27   :  { %469 = vmatpush.bf16.msrb.mxu0 %v841_v61 }
  0x28   :  { %565 = vmatpush.bf16.msrb.mxu1 %v857_v6 }
  0x2a   :  { %247 = vmatpush.bf16.msra.mxu2 %v836_v33 }
  0x2b   :  { %470 = vmatpush.bf16.msrb.mxu0 %v840_v0 }
  0x2c   :  { %566 = vmatpush.bf16.msrb.mxu1 %v856_v8 }
  0x2e   :  { %248 = vmatpush.bf16.msra.mxu2 %v835_v34 }
  0x2f   :  { %471 = vmatpush.bf16.msrb.mxu0 %v839_v4 }
  0x30   :  { %567 = vmatpush.bf16.msrb.mxu1 %v855_v12  ;;  %v884_v12 = vld [vmem:[%s1101_s6] ss:$0 sm:$0xff] }
  0x31   :  { %693 = vmatmul.msk.bf16.vlgmr.msra.gmra.mxu2 %vm33_vm0, %v196_v37 }
  0x41   :  { %694 = vmatmul.msk.bf16.gmra.mxu2 %vm33_vm0, %v197_v40 }
  0x51   :  { %695 = vmatmul.msk.bf16.gmra.mxu2 %vm33_vm0, %v198_v42 }
  0x8e   :  { %v121_v2 = vpop.f32.mrf.mxu0 }
  0x8f   :  { %v177_v3 = vpop.f32.mrf.mxu1 }
  0x90   :  { %v178_v9 = vadd.f32 %v177_v3, %v121_v2 }
  0x94   :  { %v1009_v49 = vpop.f32.mrf.mxu2 }
  0x96   :  { %v123_v10 = vpop.f32.mrf.mxu0 }
  0x97   :  { %v179_v13 = vpop.f32.mrf.mxu1 }
  0x98   :  { %v180_v19 = vadd.f32 %v179_v13, %v123_v10 }
  0x9c   :  { %v133_v56 = vpop.f32.mrf.mxu2 }
  0x9e   :  { %v126_v23 = vpop.f32.mrf.mxu0 }
  0x9f   :  { %v182_v24 = vpop.f32.mrf.mxu1 }
  0xa0   :  { %v183_v26 = vadd.f32 %v182_v24, %v126_v23 }
  0xa4   :  { %v187_v63 = vpop.f32.mrf.mxu2 }
  0xa5   :  { %v188_v45 = vadd.f32 %v187_v63, %v1009_v49 }
  0xa6   :  { %v128_v33 = vpop.f32.mrf.mxu0 }
  0xa7   :  { %v184_v34 = vpop.f32.mrf.mxu1 }
  0xa8   :  { %v185_v36 = vadd.f32 %v184_v34, %v128_v33 }
  0xac   :  { %v189_v7 = vpop.f32.mrf.mxu2 }
  0xb4   :  { %v250_v14 = vpop.f32.mrf.mxu2 }
  0xb5   :  { %v264_v15 = vadd.f32 %v250_v14, %v178_v9  ;;  %v883_v9 = vld [vmem:[%s1100_s5] ss:$0 sm:$0xff] }
  0xb7   :  { %v273_v17 = vmul.f32 %v881_v11, %v264_v15 }
  0xb9   :  { %v282_v18 = vadd.f32 %v882_v16, %v273_v17 }
  0xbb   :  { %v287_v20 = vmax.f32 %v282_v18, 0.0 }
  0xbc   :  { %v252_v21 = vpop.f32.mrf.mxu2 }
  0xbd   :  { %v265_v22 = vadd.f32 %v252_v21, %v180_v19  ;;  %295 = vst [vmem:[#allocation3 + $0x1] sm:$0xff] %v287_v20 }
  0xbf   :  { %v274_v25 = vmul.f32 %v881_v11, %v265_v22 }
  0xc1   :  { %v283_v27 = vadd.f32 %v882_v16, %v274_v25 }
  0xc3   :  { %v288_v28 = vmax.f32 %v283_v27, 0.0 }
  0xc4   :  { %v255_v29 = vpop.f32.mrf.mxu2  ;;  %v304_v39 = vld [vmem:[#allocation3] sm:$0xff] }
  0xc5   :  { %v266_v30 = vadd.f32 %v255_v29, %v183_v26  ;;  %v292_v31 = vpack.c.bf16 %v288_v28, %v287_v20  ;;  %296 = vst [vmem:[#allocation3 + $0x9] sm:$0xff] %v288_v28 }
  0xc7   :  { %v275_v32 = vmul.f32 %v881_v11, %v266_v30  ;;  %401 = vmatmul.bf16.vlgmr.msra.gmra.mxu3 %v292_v31 }
  0xc9   :  { %v284_v35 = vadd.f32 %v882_v16, %v275_v32 }
  0xcb   :  { %v289_v37 = vmax.f32 %v284_v35, 0.0 }
  0xcc   :  { %v257_v38 = vpop.f32.mrf.mxu2  ;;  %v305_v40 = vld [vmem:[#allocation3 + $0x8] sm:$0xff] }
  0xcd   :  { %v267_v41 = vadd.f32 %v257_v38, %v185_v36  ;;  %v309_v42 = vpack.c.bf16 %v305_v40, %v304_v39  ;;  %297 = vst [vmem:[#allocation3 + $0x11] sm:$0xff] %v289_v37  ;;  %v487_v51 = vld [vmem:[#allocation3 + $0x2] sm:$0xff] }
  0xce   :  { %301 = vst [vmem:[#allocation3 + $0x11] sm:$0x1] %v885_v5 }
  0xcf   :  { %v276_v43 = vmul.f32 %v881_v11, %v267_v41  ;;  %472 = vmatmul.bf16.vlgmr.msrb.gmra.mxu0 %v309_v42  ;;  %302 = vst [vmem:[#allocation3 + $0x12] sm:$0x1] %v885_v5 }
  0xd1   :  { %v285_v44 = vadd.f32 %v882_v16, %v276_v43 }
  0xd3   :  { %v290_v46 = vmax.f32 %v285_v44, 0.0 }
  0xd4   :  { %v260_v47 = vpop.f32.mrf.mxu2 }
  0xd5   :  { %v268_v48 = vadd.f32 %v260_v47, %v188_v45  ;;  %v293_v50 = vpack.c.bf16 %v290_v46, %v289_v37  ;;  %298 = vst [vmem:[#allocation3 + $0x19] sm:$0xff] %v290_v46  ;;  %v488_v52 = vld [vmem:[#allocation3 + $0xa] sm:$0xff] }
  0xd6   :  { %v492_v53 = vpack.c.bf16 %v488_v52, %v487_v51  ;;  %v306_v58 = vld [vmem:[#allocation3 + $0x10] sm:$0xff] }
  0xd7   :  { %v277_v54 = vmul.f32 %v881_v11, %v268_v48  ;;  %406 = vmatmul.bf16.gmra.mxu3 %v293_v50 }
  0xd8   :  { %568 = vmatmul.bf16.vlgmr.msrb.gmra.mxu1 %v492_v53 }
  0xd9   :  { %v286_v55 = vadd.f32 %v882_v16, %v277_v54 }
  0xdb   :  { %v291_v56 = vmax.f32 %v286_v55, 0.0 }
  0xdc   :  { %v262_v57 = vpop.f32.mrf.mxu2  ;;  %v307_v59 = vld [vmem:[#allocation3 + $0x18] sm:$0xff] }
  0xdd   :  { %v310_v5 = vpack.c.bf16 %v307_v59, %v306_v58  ;;  %299 = vst [vmem:[#allocation3 + $0x21] sm:$0x3] %v291_v56  ;;  %v489_v49 = vld [vmem:[#allocation3 + $0x12] sm:$0xff]  ;;  %v294_v61 = vpack.c.bf16 %v291_v56, %v291_v56 }
  0xdf   :  { %477 = vmatmul.bf16.gmra.mxu0 %v310_v5 }
  0xe4   :  { %v490_v60 = vld [vmem:[#allocation3 + $0x1a] sm:$0xff]  ;;  %v491_v1 = vld [vmem:[#allocation3 + $0x22] sm:$0x3] }
  0xe5   :  { %v493_v62 = vpack.c.bf16 %v490_v60, %v489_v49  ;;  %v308_v63 = vld [vmem:[#allocation3 + $0x20] sm:$0x3]  ;;  %v494_v2 = vpack.c.bf16 %v491_v1, %v491_v1 }
  0xe6   :  { %v311_v0 = vpack.c.bf16 %v308_v63, %v308_v63 }
  0xe7   :  { %411 = vmatmul.bf16.gmra.mxu3 %v294_v61 }
  0xe8   :  { %573 = vmatmul.bf16.gmra.mxu1 %v493_v62 }
  0xef   :  { %482 = vmatmul.bf16.gmra.mxu0 %v311_v0 }
  0xf8   :  { %578 = vmatmul.bf16.gmra.mxu1 %v494_v2 }
 0x14a   :  { %v402_v3 = vpop.f32.mrf.mxu3 }
 0x14c   :  { %v473_v4 = vpop.f32.mrf.mxu0 }
 0x14d   :  { %v474_v7 = vadd.f32 %v473_v4, %v402_v3 }
 0x152   :  { %v404_v6 = vpop.f32.mrf.mxu3 }
 0x154   :  { %v475_v8 = vpop.f32.mrf.mxu0 }
 0x155   :  { %v569_v10 = vpop.f32.mrf.mxu1  ;;  %v476_v16 = vadd.f32 %v475_v8, %v404_v6 }
 0x156   :  { %v583_v11 = vadd.f32 %v569_v10, %v474_v7 }
 0x158   :  { %v592_v13 = vmul.f32 %v883_v9, %v583_v11 }
 0x15a   :  { %v601_v14 = vadd.f32 %v884_v12, %v592_v13  ;;  %v407_v15 = vpop.f32.mrf.mxu3 }
 0x15c   :  { %v606_v17 = vmax.f32 %v601_v14, 0.0  ;;  %v478_v18 = vpop.f32.mrf.mxu0 }
 0x15d   :  { %v571_v19 = vpop.f32.mrf.mxu1  ;;  %v479_v24 = vadd.f32 %v478_v18, %v407_v15 }
 0x15e   :  { %611 = vst [vmem:[%s1102_s7] sm:$0xff] %v606_v17  ;;  %v584_v20 = vadd.f32 %v571_v19, %v476_v16 }
 0x160   :  { %v593_v21 = vmul.f32 %v883_v9, %v584_v20 }
 0x162   :  { %v602_v22 = vadd.f32 %v884_v12, %v593_v21  ;;  %v409_v23 = vpop.f32.mrf.mxu3 }
 0x164   :  { %v607_v25 = vmax.f32 %v602_v22, 0.0  ;;  %v480_v26 = vpop.f32.mrf.mxu0 }
 0x165   :  { %v574_v27 = vpop.f32.mrf.mxu1  ;;  %v481_v32 = vadd.f32 %v480_v26, %v409_v23 }
 0x166   :  { %612 = vst [vmem:[%s1102_s7 + $0x8] sm:$0xff] %v607_v25  ;;  %v585_v28 = vadd.f32 %v574_v27, %v479_v24 }
 0x168   :  { %v594_v29 = vmul.f32 %v883_v9, %v585_v28 }
 0x16a   :  { %v603_v30 = vadd.f32 %v884_v12, %v594_v29  ;;  %v412_v31 = vpop.f32.mrf.mxu3 }
 0x16c   :  { %v608_v33 = vmax.f32 %v603_v30, 0.0  ;;  %v483_v34 = vpop.f32.mrf.mxu0 }
 0x16d   :  { %v576_v35 = vpop.f32.mrf.mxu1  ;;  %v484_v40 = vadd.f32 %v483_v34, %v412_v31 }
 0x16e   :  { %824 = vst [vmem:[%s1102_s7 + $0xe] sm:$0xfc] %v608_v33  ;;  %v586_v36 = vadd.f32 %v576_v35, %v481_v32 }
 0x170   :  { %v595_v37 = vmul.f32 %v883_v9, %v586_v36 }
 0x172   :  { %v604_v38 = vadd.f32 %v884_v12, %v595_v37  ;;  %v414_v39 = vpop.f32.mrf.mxu3 }
 0x174   :  { %v609_v41 = vmax.f32 %v604_v38, 0.0  ;;  %v485_v42 = vpop.f32.mrf.mxu0 }
 0x175   :  { %v579_v43 = vpop.f32.mrf.mxu1 }
 0x176   :  { %825 = vst [vmem:[%s1102_s7 + $0x16] sm:$0xff] %v609_v41  ;;  %v587_v44 = vadd.f32 %v579_v43, %v484_v40 }
 0x178   :  { %v596_v45 = vmul.f32 %v883_v9, %v587_v44 }
 0x17a   :  { %v605_v46 = vadd.f32 %v884_v12, %v596_v45 }
 0x17c   :  { %v610_v47 = vmax.f32 %v605_v46, 0.0 }
 0x17d   :  { %v581_v48 = vpop.f32.mrf.mxu1 }
 0x17e   :  { %826 = vst [vmem:[%s1102_s7 + $0x1e] sm:$0x3] %v610_v47 }

</bundles_post_ra>
